<compile_context>
chip_gen: v7x
topology: tpu7x:2x2x1
jax: 0.10.0
libtpu: 0.0.40
codegen_flags: <defaults>
</compile_context>

<pallas_src>
import functools

import jax
import jax.numpy as jnp
from jax import lax
from jax.experimental import pallas as pl
from jax.experimental.pallas import tpu as pltpu


def _hw_params():
    """Best-effort hardware query; conservative (v7x-safe) fallbacks."""
    vmem_bytes = 64 * 1024 * 1024      # v7x per-TensorCore VMEM
    num_cores = 1
    try:
        info = pltpu.get_tpu_info()
        vmem_bytes = int(getattr(info, "vmem_capacity_bytes", vmem_bytes))
        num_cores = int(getattr(info, "num_cores",
                                getattr(info, "num_tensorcores", 1)))
    except Exception:
        pass
    return vmem_bytes, num_cores


def _choose_row_tile(n_rows, vocab, itemsize, tile_budget_bytes, n_buffers):
    """Largest row tile whose n_buffers-deep logits buffering fits the budget."""
    per_row = max(1, vocab * itemsize)
    tn = tile_budget_bytes // (n_buffers * per_row)
    # Small-vocab path: per-step overhead dominates tiny tiles, so allow much
    # taller tiles when V is small (tile bytes stay within the same budget).
    max_rows = 4096 if vocab < 512 else 1024
    tn = max(8, min(max_rows, (tn // 8) * 8))
    if tn >= n_rows:
        return n_rows          # single block == full array dims (always legal)
    return tn


def _label_smoothing_kernel(logits_ref, targets_ref, loss_ref, *,
                            smoothing: float, ignore_index: int,
                            vocab_size: int, n_rows: int):
    # logits_ref: (TN, V) float; targets_ref: (TN, 1) int32; loss_ref: (TN, 1) f32
    x = logits_ref[...]
    tgt = targets_ref[...]
    tn = x.shape[0]

    # Row validity: inside the real [0, n_rows) range (the last grid tile may
    # be ragged and hold garbage rows) AND target != ignore_index.
    row = pl.program_id(0) * tn + lax.broadcasted_iota(jnp.int32, tgt.shape, 0)
    valid = jnp.logical_and(row < n_rows, tgt != ignore_index)          # (TN, 1)
    tgt_clamped = jnp.maximum(tgt, 0)                                   # clamp(min=0)

    # logsumexp over the vocab (lane) axis, accumulated in f32.  Casts stay in
    # the consumers so no separate f32 copy of the (TN, V) tile is pinned.
    m = jnp.max(x, axis=-1, keepdims=True).astype(jnp.float32)          # (TN, 1)
    lse = m + jnp.log(jnp.sum(jnp.exp(x.astype(jnp.float32) - m),
                              axis=-1, keepdims=True))                  # (TN, 1)

    # Fused weighted reduction: w_v = s/V everywhere plus (1-s) at the target
    # column.  Replaces the separate sum(x) and x[target] passes (one fewer
    # (TN, V) VALU/cast/load stream).  (Routing the uniform part through an
    # MXU x @ ones matvec is a further option if a bundle dump still shows
    # the VALU slot saturating on v6e.)
    uniform = smoothing / vocab_size
    iota = lax.broadcasted_iota(jnp.int32, x.shape, 1)                  # (TN, V)
    w = jnp.where(iota == tgt_clamped, 1.0 - smoothing + uniform, uniform)
    sum_wx = jnp.sum(w * x.astype(jnp.float32), axis=-1, keepdims=True)  # (TN, 1)

    # jnp.where (not valid * loss): garbage rows of a ragged tile may be NaN/Inf
    # and 0 * NaN = NaN; select keeps them out entirely.
    loss_ref[...] = jnp.where(valid, lse - sum_wx, 0.0)


def label_smoothing_loss(logits, targets, *, smoothing=0.1, ignore_index=-100,
                         reduction="mean", row_tile=None):
    """JAX/Pallas equivalent of LabelSmoothingLoss.forward.

    logits: [B, S, V] float; targets: [B, S] int.
    """
    B, S, V = logits.shape
    N = B * S
    logits_flat = logits.reshape(N, V)
    targets_flat = targets.reshape(N, 1).astype(jnp.int32)
    itemsize = jnp.dtype(logits.dtype).itemsize

    vmem_bytes, num_cores = _hw_params()
    big_vmem = vmem_bytes >= 100 * 1024 * 1024          # v5e / v6e (128 MiB)
    if big_vmem:
        tile_budget, vmem_limit, n_buffers = 56 << 20, 96 << 20, 3
    else:                                               # v7x: 64 MiB per core
        tile_budget, vmem_limit, n_buffers = 24 << 20, 44 << 20, 2

    if row_tile is not None:
        tn = min(N, max(1, int(row_tile)))
        if tn < N:
            tn = max(8, (tn // 8) * 8)
    else:
        tn = _choose_row_tile(N, V, itemsize, tile_budget, n_buffers)

    num_tiles = pl.cdiv(N, tn)
    grid = (num_tiles,)

    # Deep (3-buffer) logits pipelining only where VMEM is plentiful and the
    # grid is long enough to benefit.
    if big_vmem and n_buffers > 2 and num_tiles >= 3:
        logits_spec = pl.BlockSpec((tn, V), lambda i: (i, 0),
                                   pipeline_mode=pl.Buffered(n_buffers))
    else:
        logits_spec = pl.BlockSpec((tn, V), lambda i: (i, 0))

    # Rows are independent; on multi-TensorCore chips (v7x) shard the row grid
    # axis across cores explicitly.
    if num_cores > 1 and num_tiles >= num_cores:
        dim_sem = (pltpu.CORE_PARALLEL,)
    else:
        dim_sem = ("parallel",)

    kernel = functools.partial(
        _label_smoothing_kernel,
        smoothing=float(smoothing),
        ignore_index=int(ignore_index),
        vocab_size=int(V),
        n_rows=int(N),
    )

    loss_flat = pl.pallas_call(
        kernel,
        out_shape=jax.ShapeDtypeStruct((N, 1), jnp.float32),
        grid_spec=pltpu.PrefetchScalarGridSpec(
            num_scalar_prefetch=0,
            grid=grid,
            in_specs=[
                logits_spec,
                pl.BlockSpec((tn, 1), lambda i: (i, 0)),
            ],
            out_specs=pl.BlockSpec((tn, 1), lambda i: (i, 0)),
        ),
        compiler_params=pltpu.CompilerParams(
            dimension_semantics=dim_sem,
            vmem_limit_bytes=vmem_limit,
        ),
    )(logits_flat, targets_flat)

    loss = loss_flat.reshape(B, S)
    if reduction == "none":
        return loss
    elif reduction == "sum":
        return jnp.sum(loss)
    elif reduction == "mean":
        mask = (targets != ignore_index).astype(jnp.float32)
        # NaN when every token is ignore_index — matches the PyTorch reference.
        return jnp.sum(loss) / jnp.sum(mask)
    else:
        raise ValueError(f"Unknown reduction: {reduction}")


def _reference(logits, targets, smoothing=0.1, ignore_index=-100, reduction="mean"):
    """Pure-JAX reference mirroring the PyTorch module."""
    B, S, V = logits.shape
    mask = (targets != ignore_index)
    one_hot = jax.nn.one_hot(jnp.maximum(targets, 0), V, dtype=jnp.float32)
    smooth = one_hot * (1.0 - smoothing) + smoothing / V
    smooth = smooth * mask[..., None].astype(jnp.float32)
    log_probs = jax.nn.log_softmax(logits.astype(jnp.float32), axis=-1)
    loss = -jnp.sum(smooth * log_probs, axis=-1)
    loss = loss * mask.astype(jnp.float32)
    if reduction == "none":
        return loss
    if reduction == "sum":
        return jnp.sum(loss)
    return jnp.sum(loss) / jnp.sum(mask.astype(jnp.float32))


if __name__ == "__main__":
    key = jax.random.PRNGKey(0)

    # Case 1: B=2, S=8, V=32 (single tile).
    # Case 2: B=2, S=9, V=32 with row_tile=8 -> ragged last tile (exercises the
    #         in-kernel row mask / no-padding path).
    cases = [
        dict(B=2, S=8, V=32, row_tile=None),
        dict(B=2, S=9, V=32, row_tile=8),
    ]
    for c in cases:
        k1, k2, key = jax.random.split(key, 3)
        B, S, V = c["B"], c["S"], c["V"]
        logits = jax.random.normal(k1, (B, S, V), dtype=jnp.float32)
        targets = jax.random.randint(k2, (B, S), 0, V, dtype=jnp.int32)
        # Mark a couple of positions as ignored (ignore_index = -100).
        targets = targets.at[0, 3].set(-100).at[1, 5].set(-100)

        for red in ("mean", "sum", "none"):
            out = label_smoothing_loss(logits, targets, smoothing=0.1,
                                       ignore_index=-100, reduction=red,
                                       row_tile=c["row_tile"])
            out = jax.block_until_ready(out)
            ref = _reference(logits, targets, smoothing=0.1,
                             ignore_index=-100, reduction=red)
            assert jnp.allclose(out, ref, rtol=1e-5, atol=1e-5), (c, red, out, ref)

    print("KERNEL_OK")
</pallas_src>

<mosaic_0001>
module attributes {stable_mosaic.version = 11 : i64} {
  func.func @_label_smoothing_kernel(%arg0: i32, %arg1: memref<16x32xf32, #tpu.memory_space<vmem>>, %arg2: memref<16x1xi32, #tpu.memory_space<vmem>>, %arg3: memref<16x1xf32, #tpu.memory_space<vmem>>) attributes {dimension_semantics = [#tpu.dimension_semantics<parallel>], iteration_bounds = array<i64: 1>, scalar_prefetch = 0 : i64, scratch_operands = 0 : i64, tpu.core_type = #tpu.core_type<tc>, window_params = [{transform_indices = @transform_0, window_bounds = array<i64: 16, 32>}, {transform_indices = @transform_1, window_bounds = array<i64: 16, 1>}, {transform_indices = @transform_2, window_bounds = array<i64: 16, 1>}]} {
    %c0 = arith.constant 0 : index
    %c0_0 = arith.constant 0 : index
    %0 = vector.load %arg1[%c0, %c0_0] : memref<16x32xf32, #tpu.memory_space<vmem>>, vector<16x32xf32>
    %c0_1 = arith.constant 0 : index
    %c0_2 = arith.constant 0 : index
    %1 = vector.load %arg2[%c0_1, %c0_2] : memref<16x1xi32, #tpu.memory_space<vmem>>, vector<16x1xi32>
    %c16_i32 = arith.constant 16 : i32
    %2 = arith.muli %arg0, %c16_i32 : i32
    %3 = tpu.iota {dimensions = array<i32: 0>} : vector<16x1xi32>
    %4 = vector.broadcast %2 : i32 to vector<16x1xi32>
    %5 = arith.addi %4, %3 : vector<16x1xi32>
    %c16_i32_3 = arith.constant 16 : i32
    %6 = vector.broadcast %c16_i32_3 : i32 to vector<16x1xi32>
    %7 = arith.cmpi slt, %5, %6 : vector<16x1xi32>
    %c-100_i32 = arith.constant -100 : i32
    %8 = vector.broadcast %c-100_i32 : i32 to vector<16x1xi32>
    %9 = arith.cmpi ne, %1, %8 : vector<16x1xi32>
    %10 = arith.andi %7, %9 : vector<16x1xi1>
    %c0_i32 = arith.constant 0 : i32
    %11 = vector.broadcast %c0_i32 : i32 to vector<16x1xi32>
    %12 = arith.maxsi %1, %11 : vector<16x1xi32>
    %cst = arith.constant dense<0xFF800000> : vector<16xf32>
    %13 = vector.multi_reduction <maximumf>, %0, %cst [1] : vector<16x32xf32> to vector<16xf32>
    %14 = vector.shape_cast %13 : vector<16xf32> to vector<16x1xf32>
    %15 = vector.broadcast %14 : vector<16x1xf32> to vector<16x32xf32>
    %16 = arith.subf %0, %15 : vector<16x32xf32>
    %17 = math.exp %16 : vector<16x32xf32>
    %cst_4 = arith.constant dense<0.000000e+00> : vector<16xf32>
    %18 = vector.multi_reduction <add>, %17, %cst_4 [1] : vector<16x32xf32> to vector<16xf32>
    %19 = vector.shape_cast %18 : vector<16xf32> to vector<16x1xf32>
    %20 = math.log %19 : vector<16x1xf32>
    %21 = arith.addf %14, %20 : vector<16x1xf32>
    %22 = tpu.iota {dimensions = array<i32: 1>} : vector<16x32xi32>
    %23 = vector.broadcast %12 : vector<16x1xi32> to vector<16x32xi32>
    %24 = arith.cmpi eq, %22, %23 : vector<16x32xi32>
    %cst_5 = arith.constant 0.903124988 : f32
    %cst_6 = arith.constant 3.125000e-03 : f32
    %25 = vector.broadcast %cst_5 : f32 to vector<16x32xf32>
    %26 = vector.broadcast %cst_6 : f32 to vector<16x32xf32>
    %27 = arith.select %24, %25, %26 : vector<16x32xi1>, vector<16x32xf32>
    %28 = arith.mulf %27, %0 : vector<16x32xf32>
    %cst_7 = arith.constant dense<0.000000e+00> : vector<16xf32>
    %29 = vector.multi_reduction <add>, %28, %cst_7 [1] : vector<16x32xf32> to vector<16xf32>
    %30 = vector.shape_cast %29 : vector<16xf32> to vector<16x1xf32>
    %31 = arith.subf %21, %30 : vector<16x1xf32>
    %cst_8 = arith.constant 0.000000e+00 : f32
    %32 = vector.broadcast %cst_8 : f32 to vector<16x1xf32>
    %33 = arith.select %10, %31, %32 : vector<16x1xi1>, vector<16x1xf32>
    %c0_9 = arith.constant 0 : index
    %c0_10 = arith.constant 0 : index
    %34 = vector.load %arg3[%c0_9, %c0_10] : memref<16x1xf32, #tpu.memory_space<vmem>>, vector<16x1xf32>
    tpu.vector_store %arg3[%c0_9, %c0_10], %33 {strides = array<i32>} : memref<16x1xf32, #tpu.memory_space<vmem>>, vector<16x1xf32>,
    return
  }
  func.func @transform_0(%arg0: i32) -> (i32, i32) {
    %c0_i32 = arith.constant 0 : i32
    %c0_i32_0 = arith.constant 0 : i32
    return %arg0, %c0_i32 : i32, i32
  }
  func.func @transform_1(%arg0: i32) -> (i32, i32) {
    %c0_i32 = arith.constant 0 : i32
    %c0_i32_0 = arith.constant 0 : i32
    return %arg0, %c0_i32 : i32, i32
  }
  func.func @transform_2(%arg0: i32) -> (i32, i32) {
    %c0_i32 = arith.constant 0 : i32
    %c0_i32_0 = arith.constant 0 : i32
    return %arg0, %c0_i32 : i32, i32
  }
}

</mosaic_0001>

<bundles_post_ra>
// kernel: tpu_custom_call.1
= control target key start
LH: loop header
LB: loop body
LE: loop exit
PB: predicated region body
PF: predicated region fallthrough
CT: control target
= control target key end

     0   :  { %vm32_vm0 = vcmask 261120   ;;  %v100_v2 = vmov 0   ;;  %v57_v10 = vlaneseq  ;;  %v101_v19 = vmov 0.003125   ;;  %s141_s0 = inlined_call_operand.vmem [shape: f32[16,32], index: 0, kind: input, shape index: {}]   ;;  %s142_s1 = inlined_call_operand.vmem [shape: s32[16,1], index: 1, kind: input, shape index: {}]   ;;  %s143_s2 = inlined_call_operand.vmem [shape: f32[16,1], index: 2, kind: output, shape index: {}]  }
   0x1   :  { %v11_v0 = vld [vmem:[%s141_s0] sm:$0xff]  ;;  %v12_v1 = vld [vmem:[%s141_s0 + $0x8] sm:$0xff]  ;;  %90 = vset.pattern.permute.xlu1 %v100_v2  ;;  %91 = vset.pattern.permute.xlu0 %v100_v2  ;;  %vm81_vm6 = vcmask 7168  }
   0x2   :  { %v13_v3 = vld [vmem:[%s142_s1] sm:$0xff]  ;;  %v33_v4 = vsel %vm32_vm0, %v11_v0, -inf  ;;  %v14_v5 = vld [vmem:[%s142_s1 + $0x8] sm:$0xff]  ;;  %v36_v7 = vsel %vm32_vm0, %v12_v1, -inf  ;;  %v58_v15 = vand.u32 127, %v57_v10 }
   0x3   :  { %vm28_vm1 = vcmp.gt.s32.totalorder %v13_v3, 0  ;;  %34 = vmax.xlane.f32.xlu0 %v33_v4  ;;  %vm30_vm2 = vcmp.gt.s32.totalorder %v14_v5, 0  ;;  %vm24_vm5 = vcmp.ne.s32.totalorder %v13_v3, 4294967196  ;;  %vm25_vm7 = vcmp.ne.s32.totalorder %v14_v5, 4294967196 }
   0x4   :  { %v29_v6 = vsel %vm28_vm1, %v13_v3, 0  ;;  %v31_v8 = vsel %vm30_vm2, %v14_v5, 0 }
   0x5   :  { %60 = vperm.xlu1 %90, %v29_v6  }
   0x7   :  { %37 = vmax.xlane.f32.xlu0 %v36_v7 }
   0x9   :  { %63 = vperm.xlu1 %90, %v31_v8  }
  0x84   :  { %v61_v13 = vpop.permute.xlu1 %60 }
  0x85   :  { %vm65_vm3 = vcmp.eq.s32.totalorder %v58_v15, %v61_v13 }
  0x86   :  { %v67_v20 = vsel %vm65_vm3, 0.903125, %v101_v19 }
  0x87   :  { %v69_v21 = vmul.f32 %v67_v20, %v11_v0 }
  0x88   :  { %v64_v18 = vpop.permute.xlu1 %63 }
  0x89   :  { %vm66_vm4 = vcmp.eq.s32.totalorder %v58_v15, %v64_v18  ;;  %v71_v25 = vsel %vm32_vm0, %v69_v21, 0.0 }
  0x8a   :  { %v68_v23 = vsel %vm66_vm4, 0.903125, %v101_v19 }
  0x8b   :  { %v70_v26 = vmul.f32 %v68_v23, %v12_v1 }
  0x8d   :  { %v74_v29 = vsel %vm32_vm0, %v70_v26, 0.0 }
  0x90   :  { %v35_v9 = vpop.xlane.xlu0 %34 }
  0x91   :  { %v39_v11 = vsub.f32 %v11_v0, %v35_v9 }
  0x93   :  { %v41_v12 = vmul.f32 1.442695, %v39_v11 }
  0x94   :  { %v38_v14 = vpop.xlane.xlu0 %37 }
  0x95   :  { %92 = vpow2.f32 %v41_v12  ;;  %v40_v16 = vsub.f32 %v12_v1, %v38_v14 }
  0x97   :  { %v43_v17 = vmul.f32 1.442695, %v40_v16 }
  0x99   :  { %94 = vpow2.f32 %v43_v17 }
  0x9f   :  { %v93_v22 = vpop.eup %92 }
  0xa0   :  { %v45_v24 = vsel %vm32_vm0, %v93_v22, 0.0 }
  0xa1   :  { %46 = vadd.xlane.f32.xlu0 %v45_v24 }
  0xa3   :  { %v95_v27 = vpop.eup %94 }
  0xa4   :  { %v48_v28 = vsel %vm32_vm0, %v95_v27, 0.0 }
  0xa5   :  { %49 = vadd.xlane.f32.xlu1 %v48_v28  ;;  %72 = vadd.xlane.f32.xlu0 %v71_v25 }
  0xa9   :  { %75 = vadd.xlane.f32.xlu0 %v74_v29 }
 0x12e   :  { %v47_v30 = vpop.xlane.xlu0 %46 }
 0x12f   :  { %96 = vlog2.f32 %v47_v30 }
 0x132   :  { %v50_v31 = vpop.xlane.xlu1 %49  ;;  %v73_v34 = vpop.xlane.xlu0 %72 }
 0x133   :  { %98 = vlog2.f32 %v50_v31 }
 0x136   :  { %v76_v41 = vpop.xlane.xlu0 %75 }
 0x139   :  { %v97_v32 = vpop.eup %96 }
 0x13a   :  { %v52_v33 = vmul.f32 0.6931472, %v97_v32 }
 0x13c   :  { %v55_v35 = vadd.f32 %v52_v33, %v35_v9 }
 0x13d   :  { %v99_v36 = vpop.eup %98 }
 0x13e   :  { %v54_v37 = vmul.f32 0.6931472, %v99_v36  ;;  %v77_v38 = vsub.f32 %v55_v35, %v73_v34 }
 0x140   :  { %v79_v39 = vsel %vm24_vm5, %v77_v38, 0.0  ;;  %v56_v40 = vadd.f32 %v54_v37, %v38_v14 }
 0x141   :  { %82 = vst.msk [vmem:[%s143_s2] sm:$0xff] %vm81_vm6, %v79_v39 }
 0x142   :  { %v78_v42 = vsub.f32 %v56_v40, %v76_v41 }
 0x144   :  { %v80_v43 = vsel %vm25_vm7, %v78_v42, 0.0 }
 0x145   :  { %83 = vst.msk [vmem:[%s143_s2 + $0x8] sm:$0xff] %vm81_vm6, %v80_v43 }

</bundles_post_ra>
